<compile_context>
chip_gen: v6e
topology: v6e:2x2x1
jax: 0.10.0
libtpu: 0.0.40
codegen_flags: <defaults>
</compile_context>

<pallas_src>
import functools

import jax
import jax.numpy as jnp
import numpy as np
from jax import lax
from jax.experimental import pallas as pl
from jax.experimental.pallas import tpu as pltpu


def _round_up(x, m):
    return ((x + m - 1) // m) * m


def _dot(a, b):
    # MXU dot with f32 accumulation; casts LHS to the weight dtype so bf16
    # weights get a pure-bf16 MXU path while gate math stays f32.
    return jnp.dot(a.astype(b.dtype), b, preferred_element_type=jnp.float32)


# ----------------------------------------------------------------------------
# Teacher-forcing kernel: input gates hoisted, loop only does 2 matmuls/step.
# ----------------------------------------------------------------------------
def _gru_tf_kernel(x_ref, h0_ref, wih_ref, whh_ref, bih_ref, bhh_ref,
                   wout_ref, bout_ref, logits_ref, hfin_ref, igate_scr,
                   *, seq_len, hidden_size, batch):
    T, H, B = seq_len, hidden_size, batch

    # Hoisted input-side gate precompute: one big (T*B, H) @ (H, 3H) matmul.
    igate_scr[...] = _dot(x_ref[...], wih_ref[...]) + bih_ref[...]

    w_hh = whh_ref[...]
    b_hh = bhh_ref[...]
    w_out = wout_ref[...]
    b_out = bout_ref[...]

    def step(t, h):
        start = pl.multiple_of(t * B, B)
        ig = igate_scr[pl.ds(start, B), :]                         # (B, 3H)
        hg = _dot(h, w_hh) + b_hh                                  # (B, 3H)
        r = jax.nn.sigmoid(ig[:, 0:H] + hg[:, 0:H])
        z = jax.nn.sigmoid(ig[:, H:2 * H] + hg[:, H:2 * H])
        n = jnp.tanh(ig[:, 2 * H:3 * H] + r * hg[:, 2 * H:3 * H])
        h_new = (1.0 - z) * n + z * h
        logits = _dot(h_new, w_out) + b_out                        # (B, Vp)
        logits_ref[t] = logits
        return h_new

    h_final = lax.fori_loop(0, T, step, h0_ref[...])
    hfin_ref[...] = h_final                  # written exactly once


# ----------------------------------------------------------------------------
# Greedy kernel: embedding + input projection fused into one (V, 3H) table.
# ----------------------------------------------------------------------------
def _gru_greedy_kernel(h0_ref, emb_ref, wih_ref, whh_ref, bih_ref, bhh_ref,
                       wout_ref, bout_ref, logits_ref, hfin_ref, eproj_scr,
                       *, seq_len, hidden_size, sos_token, vocab_size):
    T, H, V = seq_len, hidden_size, vocab_size
    B = h0_ref.shape[0]
    Vp = wout_ref.shape[1]

    # One-time fusion: emb_table @ W_ih + b_ih  -> (V, 3H).
    eproj_scr[...] = _dot(emb_ref[...], wih_ref[...]) + bih_ref[...]

    w_hh = whh_ref[...]
    b_hh = bhh_ref[...]
    w_out = wout_ref[...]
    b_out = bout_ref[...]

    lane_v = jax.lax.broadcasted_iota(jnp.int32, (B, V), 1)
    onehot0 = (lane_v == sos_token).astype(jnp.float32)   # SOS for every row

    def step(t, carry):
        h, onehot = carry
        ig = _dot(onehot, eproj_scr[...])                          # (B, 3H)
        hg = _dot(h, w_hh) + b_hh
        r = jax.nn.sigmoid(ig[:, 0:H] + hg[:, 0:H])
        z = jax.nn.sigmoid(ig[:, H:2 * H] + hg[:, H:2 * H])
        n = jnp.tanh(ig[:, 2 * H:3 * H] + r * hg[:, 2 * H:3 * H])
        h_new = (1.0 - z) * n + z * h
        logits = _dot(h_new, w_out) + b_out                        # (B, Vp)
        logits_ref[t] = logits
        # next input = argmax(logits) (first max on ties, like .topk(1));
        # padded lanes carry a -1e30 bias so they can never win.
        mx = jnp.max(logits, axis=-1, keepdims=True)
        lane_p = jax.lax.broadcasted_iota(jnp.int32, (B, Vp), 1)
        idx = jnp.min(jnp.where(logits >= mx, lane_p, Vp), axis=-1,
                      keepdims=True)
        onehot_next = (lane_v == idx).astype(jnp.float32)
        return h_new, onehot_next

    h_final, _ = lax.fori_loop(0, T, step, (h0_ref[...], onehot0))
    hfin_ref[...] = h_final


# ----------------------------------------------------------------------------
# Wrapper: parameter plumbing + pallas_call
# ----------------------------------------------------------------------------
def decoder_forward_pallas(params, h0, target_tokens, *, use_tf, sos_token,
                           num_steps, param_dtype=jnp.float32):
    emb_tab = params["embedding"]              # (V, H)
    w_ih, w_hh = params["w_ih"], params["w_hh"]    # (H, 3H) each (r|z|n cols)
    b_ih, b_hh = params["b_ih"], params["b_hh"]    # (1, 3H)
    w_out, b_out = params["w_out"], params["b_out"]  # (H, V), (1, V)
    V, H = emb_tab.shape
    B = h0.shape[0]
    T = num_steps

    # Lane-dense output projection: pad V up to a multiple of 128.  Padded
    # bias lanes get -1e30 so the greedy argmax can never pick them; the
    # padded logits are sliced off below.
    Vp = _round_up(V, 128)
    w_out_p = jnp.pad(w_out, ((0, 0), (0, Vp - V))).astype(param_dtype)
    b_out_p = jnp.pad(b_out, ((0, 0), (0, Vp - V)), constant_values=-1e30)

    w_ih_c = w_ih.astype(param_dtype)
    w_hh_c = w_hh.astype(param_dtype)

    vmem = pl.BlockSpec(memory_space=pltpu.MemorySpace.VMEM)
    cparams = pltpu.CompilerParams(vmem_limit_bytes=32 * 1024 * 1024)
    out_shape = (jax.ShapeDtypeStruct((T, B, Vp), jnp.float32),
                 jax.ShapeDtypeStruct((B, H), jnp.float32))
    out_specs = (vmem, vmem)

    if use_tf:
        # TODO(synk): the PyTorch forward always iterates over len(target);
        # steps beyond the provided targets are undefined, so require T <= len.
        assert target_tokens.shape[0] >= T, "need a target token per step"
        # Embedding gather + flatten to (T*B, H): plain-JAX glue, no (T,B,V)
        # one-hot ever hits HBM.
        x = jnp.take(emb_tab, target_tokens[:T], axis=0)
        x = x.reshape(T * B, H).astype(param_dtype)
        kern = functools.partial(_gru_tf_kernel, seq_len=T, hidden_size=H,
                                 batch=B)
        logits_p, h_final = pl.pallas_call(
            kern,
            out_shape=out_shape,
            in_specs=[vmem] * 8,
            out_specs=out_specs,
            scratch_shapes=[pltpu.VMEM((T * B, 3 * H), jnp.float32)],
            compiler_params=cparams,
        )(x, h0, w_ih_c, w_hh_c, b_ih, b_hh, w_out_p, b_out_p)
    else:
        kern = functools.partial(_gru_greedy_kernel, seq_len=T, hidden_size=H,
                                 sos_token=sos_token, vocab_size=V)
        logits_p, h_final = pl.pallas_call(
            kern,
            out_shape=out_shape,
            in_specs=[vmem] * 8,
            out_specs=out_specs,
            scratch_shapes=[pltpu.VMEM((V, 3 * H), jnp.float32)],
            compiler_params=cparams,
        )(h0, emb_tab.astype(param_dtype), w_ih_c, w_hh_c, b_ih, b_hh,
          w_out_p, b_out_p)

    return logits_p[:, :, :V], h_final


# ----------------------------------------------------------------------------
# Pure-JAX reference (mirrors PyTorch nn.GRU + nn.Linear semantics)
# ----------------------------------------------------------------------------
def decoder_forward_ref(params, h0, target_tokens, *, use_tf, sos_token,
                        num_steps):
    emb_tab = params["embedding"]
    w_ih, w_hh = params["w_ih"], params["w_hh"]
    b_ih, b_hh = params["b_ih"], params["b_hh"]
    w_out, b_out = params["w_out"], params["b_out"]
    B, H = h0.shape

    h = h0
    tok = jnp.full((B,), sos_token, jnp.int32)
    outs = []
    for t in range(num_steps):
        if use_tf:
            tok = target_tokens[t]
        x = emb_tab[tok]
        ig = x @ w_ih + b_ih
        hg = h @ w_hh + b_hh
        r = jax.nn.sigmoid(ig[:, 0:H] + hg[:, 0:H])
        z = jax.nn.sigmoid(ig[:, H:2 * H] + hg[:, H:2 * H])
        n = jnp.tanh(ig[:, 2 * H:3 * H] + r * hg[:, 2 * H:3 * H])
        h = (1.0 - z) * n + z * h
        logits = h @ w_out + b_out
        if not use_tf:
            tok = jnp.argmax(logits, axis=-1).astype(jnp.int32)
        outs.append(logits)
    return jnp.stack(outs), h


# ----------------------------------------------------------------------------
# Deterministic parameter init (shapes implied by the module's __init__),
# with the r/z/n gate weights stored pre-transposed & concatenated: (H, 3H).
# ----------------------------------------------------------------------------
def init_params(key, hidden_size, output_size):
    H, V = hidden_size, output_size
    ks = jax.random.split(key, 7)
    s = 1.0 / np.sqrt(H)
    return {
        "embedding": jax.random.normal(ks[0], (V, H), jnp.float32),
        "w_ih": jax.random.uniform(ks[1], (H, 3 * H), jnp.float32, -s, s),
        "w_hh": jax.random.uniform(ks[2], (H, 3 * H), jnp.float32, -s, s),
        "b_ih": jax.random.uniform(ks[3], (1, 3 * H), jnp.float32, -s, s),
        "b_hh": jax.random.uniform(ks[4], (1, 3 * H), jnp.float32, -s, s),
        "w_out": jax.random.uniform(ks[5], (H, V), jnp.float32, -s, s),
        "b_out": jax.random.uniform(ks[6], (1, V), jnp.float32, -s, s),
    }


if __name__ == "__main__":
    H, V, T, B = 32, 16, 8, 8     # hidden_size, output_size(vocab), seq, batch
    SOS = 1

    key = jax.random.PRNGKey(0)
    params = init_params(key, H, V)
    k_h, k_t = jax.random.split(jax.random.fold_in(key, 7))
    h0 = 0.1 * jax.random.normal(k_h, (B, H), jnp.float32)       # hidden (B, H)
    target = jax.random.randint(k_t, (T, B), 0, V, jnp.int32)    # (T, B) time-major

    # The PyTorch forward flips a coin (random.random() < tf_ratio) to pick a
    # path; here we exercise BOTH deterministic branches of that forward.
    for use_tf in (True, False):
        logits, h_final = decoder_forward_pallas(
            params, h0, target, use_tf=use_tf, sos_token=SOS, num_steps=T)
        jax.block_until_ready((logits, h_final))

        ref_logits, ref_h = decoder_forward_ref(
            params, h0, target, use_tf=use_tf, sos_token=SOS, num_steps=T)
        np.testing.assert_allclose(np.asarray(logits), np.asarray(ref_logits),
                                   rtol=1e-5, atol=1e-5)
        np.testing.assert_allclose(np.asarray(h_final), np.asarray(ref_h),
                                   rtol=1e-5, atol=1e-5)

    # bf16-weight path (v6e/v7x recommendation): bf16 dot inputs, f32
    # accumulation and f32 gate math / hidden carry.  Loose tolerance vs the
    # f32 reference; teacher-forcing only (greedy argmax could legitimately
    # diverge under weight quantization).
    logits_bf16, h_bf16 = decoder_forward_pallas(
        params, h0, target, use_tf=True, sos_token=SOS, num_steps=T,
        param_dtype=jnp.bfloat16)
    jax.block_until_ready((logits_bf16, h_bf16))
    ref_logits, ref_h = decoder_forward_ref(
        params, h0, target, use_tf=True, sos_token=SOS, num_steps=T)
    np.testing.assert_allclose(np.asarray(logits_bf16), np.asarray(ref_logits),
                               rtol=1e-1, atol=1e-1)

    print("KERNEL_OK")
</pallas_src>

<mosaic_0001>
module attributes {stable_mosaic.version = 11 : i64} {
  func.func @_gru_tf_kernel(%arg0: memref<64x32xf32, #tpu.memory_space<vmem>>, %arg1: memref<8x32xf32, #tpu.memory_space<vmem>>, %arg2: memref<32x96xf32, #tpu.memory_space<vmem>>, %arg3: memref<32x96xf32, #tpu.memory_space<vmem>>, %arg4: memref<1x96xf32, #tpu.memory_space<vmem>>, %arg5: memref<1x96xf32, #tpu.memory_space<vmem>>, %arg6: memref<32x128xf32, #tpu.memory_space<vmem>>, %arg7: memref<1x128xf32, #tpu.memory_space<vmem>>, %arg8: memref<8x8x128xf32, #tpu.memory_space<vmem>>, %arg9: memref<8x32xf32, #tpu.memory_space<vmem>>, %arg10: memref<64x96xf32, #tpu.memory_space<vmem>>) attributes {dimension_semantics = [], scalar_prefetch = 0 : i64, scratch_operands = 1 : i64, tpu.core_type = #tpu.core_type<tc>} {
    %c0 = arith.constant 0 : index
    %c0_0 = arith.constant 0 : index
    %0 = vector.load %arg0[%c0, %c0_0] : memref<64x32xf32, #tpu.memory_space<vmem>>, vector<64x32xf32>
    %c0_1 = arith.constant 0 : index
    %c0_2 = arith.constant 0 : index
    %1 = vector.load %arg2[%c0_1, %c0_2] : memref<32x96xf32, #tpu.memory_space<vmem>>, vector<32x96xf32>
    %cst = arith.constant dense<0.000000e+00> : vector<64x96xf32>
    %2 = tpu.matmul %0, %1, %cst {dimension_numbers = #tpu.dot_dimension_numbers<[1], [0], [0], [1], [0, 0, 1, 1], [], []>} : vector<64x32xf32>, vector<32x96xf32>, vector<64x96xf32> -> vector<64x96xf32>
    %c0_3 = arith.constant 0 : index
    %c0_4 = arith.constant 0 : index
    %3 = vector.load %arg4[%c0_3, %c0_4] : memref<1x96xf32, #tpu.memory_space<vmem>>, vector<1x96xf32>
    %4 = vector.broadcast %3 : vector<1x96xf32> to vector<64x96xf32>
    %5 = arith.addf %2, %4 : vector<64x96xf32>
    %c0_5 = arith.constant 0 : index
    %c0_6 = arith.constant 0 : index
    %6 = vector.load %arg10[%c0_5, %c0_6] : memref<64x96xf32, #tpu.memory_space<vmem>>, vector<64x96xf32>
    tpu.vector_store %arg10[%c0_5, %c0_6], %5 {strides = array<i32>} : memref<64x96xf32, #tpu.memory_space<vmem>>, vector<64x96xf32>,
    %c0_7 = arith.constant 0 : index
    %c0_8 = arith.constant 0 : index
    %7 = vector.load %arg3[%c0_7, %c0_8] : memref<32x96xf32, #tpu.memory_space<vmem>>, vector<32x96xf32>
    %c0_9 = arith.constant 0 : index
    %c0_10 = arith.constant 0 : index
    %8 = vector.load %arg5[%c0_9, %c0_10] : memref<1x96xf32, #tpu.memory_space<vmem>>, vector<1x96xf32>
    %c0_11 = arith.constant 0 : index
    %c0_12 = arith.constant 0 : index
    %9 = vector.load %arg6[%c0_11, %c0_12] : memref<32x128xf32, #tpu.memory_space<vmem>>, vector<32x128xf32>
    %c0_13 = arith.constant 0 : index
    %c0_14 = arith.constant 0 : index
    %10 = vector.load %arg7[%c0_13, %c0_14] : memref<1x128xf32, #tpu.memory_space<vmem>>, vector<1x128xf32>
    %c0_15 = arith.constant 0 : index
    %c0_16 = arith.constant 0 : index
    %11 = vector.load %arg1[%c0_15, %c0_16] : memref<8x32xf32, #tpu.memory_space<vmem>>, vector<8x32xf32>
    %c0_i32 = arith.constant 0 : i32
    %c8_i32 = arith.constant 8 : i32
    %12 = arith.addi %c0_i32, %c8_i32 : i32
    %c1_i32 = arith.constant 1 : i32
    %13 = scf.for %arg11 = %c0_i32 to %12 step %c1_i32 iter_args(%arg12 = %11) -> (vector<8x32xf32>)  : i32 {
      %c8_i32_20 = arith.constant 8 : i32
      %15 = arith.muli %arg11, %c8_i32_20 : i32
      %16 = tpu.assume_multiple %15, 8 : i32
      %17 = arith.index_cast %16 : i32 to index
      %c0_21 = arith.constant 0 : index
      %18 = vector.load %arg10[%17, %c0_21] : memref<64x96xf32, #tpu.memory_space<vmem>>, vector<8x96xf32>
      %cst_22 = arith.constant dense<0.000000e+00> : vector<8x96xf32>
      %19 = tpu.matmul %arg12, %7, %cst_22 {dimension_numbers = #tpu.dot_dimension_numbers<[1], [0], [0], [1], [0, 0, 1, 1], [], []>} : vector<8x32xf32>, vector<32x96xf32>, vector<8x96xf32> -> vector<8x96xf32>
      %20 = vector.broadcast %8 : vector<1x96xf32> to vector<8x96xf32>
      %21 = arith.addf %19, %20 : vector<8x96xf32>
      %22 = vector.extract_strided_slice %18 {offsets = [0, 0], sizes = [8, 32], strides = [1, 1]} : vector<8x96xf32> to vector<8x32xf32>
      %23 = vector.extract_strided_slice %21 {offsets = [0, 0], sizes = [8, 32], strides = [1, 1]} : vector<8x96xf32> to vector<8x32xf32>
      %24 = arith.addf %22, %23 : vector<8x32xf32>
      %25 = arith.negf %24 : vector<8x32xf32>
      %26 = math.exp %25 : vector<8x32xf32>
      %cst_23 = arith.constant 1.000000e+00 : f32
      %27 = vector.broadcast %cst_23 : f32 to vector<8x32xf32>
      %28 = arith.addf %27, %26 : vector<8x32xf32>
      %29 = arith.divf %27, %28 : vector<8x32xf32>
      %30 = vector.extract_strided_slice %18 {offsets = [0, 32], sizes = [8, 32], strides = [1, 1]} : vector<8x96xf32> to vector<8x32xf32>
      %31 = vector.extract_strided_slice %21 {offsets = [0, 32], sizes = [8, 32], strides = [1, 1]} : vector<8x96xf32> to vector<8x32xf32>
      %32 = arith.addf %30, %31 : vector<8x32xf32>
      %33 = arith.negf %32 : vector<8x32xf32>
      %34 = math.exp %33 : vector<8x32xf32>
      %cst_24 = arith.constant 1.000000e+00 : f32
      %35 = vector.broadcast %cst_24 : f32 to vector<8x32xf32>
      %36 = arith.addf %35, %34 : vector<8x32xf32>
      %37 = arith.divf %35, %36 : vector<8x32xf32>
      %38 = vector.extract_strided_slice %18 {offsets = [0, 64], sizes = [8, 32], strides = [1, 1]} : vector<8x96xf32> to vector<8x32xf32>
      %39 = vector.extract_strided_slice %21 {offsets = [0, 64], sizes = [8, 32], strides = [1, 1]} : vector<8x96xf32> to vector<8x32xf32>
      %40 = arith.mulf %29, %39 : vector<8x32xf32>
      %41 = arith.addf %38, %40 : vector<8x32xf32>
      %42 = math.tanh %41 : vector<8x32xf32>
      %cst_25 = arith.constant 1.000000e+00 : f32
      %43 = vector.broadcast %cst_25 : f32 to vector<8x32xf32>
      %44 = arith.subf %43, %37 : vector<8x32xf32>
      %45 = arith.mulf %44, %42 : vector<8x32xf32>
      %46 = arith.mulf %37, %arg12 : vector<8x32xf32>
      %47 = arith.addf %45, %46 : vector<8x32xf32>
      %cst_26 = arith.constant dense<0.000000e+00> : vector<8x128xf32>
      %48 = tpu.matmul %47, %9, %cst_26 {dimension_numbers = #tpu.dot_dimension_numbers<[1], [0], [0], [1], [0, 0, 1, 1], [], []>} : vector<8x32xf32>, vector<32x128xf32>, vector<8x128xf32> -> vector<8x128xf32>
      %49 = vector.broadcast %10 : vector<1x128xf32> to vector<8x128xf32>
      %50 = arith.addf %48, %49 : vector<8x128xf32>
      %51 = arith.index_cast %arg11 : i32 to index
      %c0_27 = arith.constant 0 : index
      %c0_28 = arith.constant 0 : index
      %52 = vector.load %arg8[%51, %c0_27, %c0_28] : memref<8x8x128xf32, #tpu.memory_space<vmem>>, vector<1x8x128xf32>
      %53 = vector.shape_cast %52 : vector<1x8x128xf32> to vector<8x128xf32>
      %54 = vector.shape_cast %50 : vector<8x128xf32> to vector<1x8x128xf32>
      tpu.vector_store %arg8[%51, %c0_27, %c0_28], %54 {strides = array<i32>} : memref<8x8x128xf32, #tpu.memory_space<vmem>>, vector<1x8x128xf32>,
      scf.yield %47 : vector<8x32xf32>
    }
    %c8_i32_17 = arith.constant 8 : i32
    %c0_18 = arith.constant 0 : index
    %c0_19 = arith.constant 0 : index
    %14 = vector.load %arg9[%c0_18, %c0_19] : memref<8x32xf32, #tpu.memory_space<vmem>>, vector<8x32xf32>
    tpu.vector_store %arg9[%c0_18, %c0_19], %13 {strides = array<i32>} : memref<8x32xf32, #tpu.memory_space<vmem>>, vector<8x32xf32>,
    return
  }
}

</mosaic_0001>

<bundles_post_ra>
// kernel: tpu_custom_call.1
= control target key start
LH: loop header
LB: loop body
LE: loop exit
PB: predicated region body
PF: predicated region fallthrough
CT: control target
= control target key end

     0   :  { %15 = vsyncpa [#allocation4], 0  ;;  %s871_s0 = inlined_call_operand.vmem [shape: f32[64,32], index: 0, kind: input, shape index: {}]   ;;  %s872_s1 = inlined_call_operand.hbm [shape: f32[8,32], index: 1, kind: input, shape index: {}]   ;;  %s873_s2 = inlined_call_operand.vmem [shape: f32[32,96], index: 2, kind: input, shape index: {}]   ;;  %s874_s3 = inlined_call_operand.vmem [shape: f32[32,96], index: 3, kind: input, shape index: {}]   ;;  %s875_s4 = inlined_call_operand.vmem [shape: f32[1,96], index: 4, kind: input, shape index: {}]   ;;  %s876_s5 = inlined_call_operand.vmem [shape: f32[1,96], index: 5, kind: input, shape index: {}]   ;;  %s877_s6 = inlined_call_operand.vmem [shape: f32[32,128], index: 6, kind: input, shape index: {}]   ;;  %s878_s7 = inlined_call_operand.vmem [shape: f32[1,128], index: 7, kind: input, shape index: {}]   ;;  %s879_s8 = inlined_call_operand.hbm [shape: f32[8,8,128], index: 8, kind: output, shape index: {0}]   ;;  %s880_s9 = inlined_call_operand.hbm [shape: f32[8,32], index: 9, kind: output, shape index: {1}]  }
   0x1   :  { %16 = vsyncpa [#allocation5], 0 }
   0x2   :  { %17 = vsyncpa [#allocation8], 0  ;;  %s661_s30 = smov [#allocation3]  }
   0x3   :  { %s26_s10 = sshll.u32 %s661_s30, 4  ;;  %s27_s10 = int_to_ptr.vmem [resolvable:$true] %s26_s10 }
   0x4   :  { %s587_s11 = scalar_lea.vmem %s27_s10, 128  ;;  %p592_p1 = scmp.lt.s32.totalorder %s27_s10, %s27_s10 }
   0x5   :  { %p588_p0 = scmp.ne.s32.totalorder %s27_s10, %s587_s11  ;;  %p593_p2 = scmp.lt.s32.totalorder %s587_s11, %s587_s11 }
   0x7   :  { %p594_p3 = por %p593_p2, %p592_p1 }
   0x9   :  { %p595_p4 = pnand %p594_p3, %p588_p0 }
   0xb   :  { %598 = shalt.err (!%p595_p4)
}
   0xc   :  { %29 = dma.hbm_to_vmem [thread:$0]  %s872_s1, 128, %s27_s10, [#allocation4]  }
   0xd   :  { %647 = dma.done.wait [#allocation4], 128  }
   0xe   :  { %648 = vsyncadd [#allocation4], 4294967168  ;;  %v727_v0 = vld [vmem:[%s874_s3] sm:$0xff]  ;;  %v732_v1 = vld [vmem:[%s874_s3 + $0x8] sm:$0xff]  ;;  %vm64_vm0 = vcmask 261120   ;;  %vm194_vm1 = vcmask 785408  }
   0xf   :  { %v737_v2 = vld [vmem:[%s874_s3 + $0x10] sm:$0xff]  ;;  %v742_v3 = vld [vmem:[%s874_s3 + $0x18] sm:$0xff]  ;;  %v747_v4 = vld [vmem:[%s876_s5] ss:$0 sm:$0xff] }
  0x10   :  { %v752_v5 = vld [vmem:[%s877_s6] sm:$0xff]  ;;  %v757_v6 = vld [vmem:[%s877_s6 + $0x8] sm:$0xff]  ;;  %v762_v7 = vld [vmem:[%s877_s6 + $0x10] sm:$0xff] }
  0x11   :  { %v767_v8 = vld [vmem:[%s877_s6 + $0x18] sm:$0xff]  ;;  %v772_v9 = vld [vmem:[%s878_s7] ss:$0 sm:$0xff]  ;;  %v55_v12 = vld [vmem:[%s873_s2 + $0x10] sm:$0xff] }
  0x12   :  { %v774_v10 = vld [vmem:[#allocation3] sm:$0xff]   ;;  %v56_v11 = vld [vmem:[%s873_s2 + $0x18] sm:$0xff]  ;;  %v54_v13 = vld [vmem:[%s873_s2 + $0x8] sm:$0xff] }
  0x13   :  { %497 = vmatprep.subr.mxu0 %v56_v11  ;;  %539 = vmatprep.subr.mxu1 %v56_v11  ;;  %v53_v14 = vld [vmem:[%s873_s2] sm:$0xff]  ;;  %v46_v17 = vld [vmem:[%s871_s0 + $0x8] sm:$0xff]  ;;  %v47_v19 = vld [vmem:[%s871_s0 + $0x10] sm:$0xff] }
  0x14   :  { %498 = vmatpush3.msra.mxu0 %v56_v11  ;;  %543 = vmatpush3.msra.mxu1 %v56_v11  ;;  %v45_v15 = vld [vmem:[%s871_s0] sm:$0xff]  ;;  %v50_v18 = vld [vmem:[%s871_s0 + $0x28] sm:$0xff]  ;;  %v51_v20 = vld [vmem:[%s871_s0 + $0x30] sm:$0xff] }
  0x15   :  { %499 = vmatprep.subr.mxu0 %v55_v12  ;;  %540 = vmatprep.subr.mxu1 %v55_v12  ;;  %v49_v16 = vld [vmem:[%s871_s0 + $0x20] sm:$0xff]  ;;  %v48_v21 = vld [vmem:[%s871_s0 + $0x18] sm:$0xff] }
  0x16   :  { %500 = vmatpush3.msra.mxu0 %v55_v12  ;;  %544 = vmatpush3.msra.mxu1 %v55_v12  ;;  %v52_v22 = vld [vmem:[%s871_s0 + $0x38] sm:$0xff]  ;;  %v460_v23 = vld [vmem:[%s875_s4] ss:$0 sm:$0xff]  ;;  %s834_s0 = smov 0  }
  0x17   :  { %501 = vmatprep.subr.mxu0 %v54_v13  ;;  %541 = vmatprep.subr.mxu1 %v54_v13 }
  0x18   :  { %502 = vmatpush3.msra.mxu0 %v54_v13  ;;  %545 = vmatpush3.msra.mxu1 %v54_v13 }
  0x19   :  { %503 = vmatprep.subr.mxu0 %v53_v14  ;;  %542 = vmatprep.subr.mxu1 %v53_v14 }
  0x1a   :  { %504 = vmatpush3.msra.mxu0 %v53_v14  ;;  %546 = vmatpush3.msra.mxu1 %v53_v14 }
  0x1b   :  { %505 = vmatprep.mubr.msk.f32.mxu0 %vm64_vm0, %v45_v15  ;;  %511 = vmatprep.mubr.msk.f32.mxu1 %vm64_vm0, %v49_v16 }
  0x1c   :  { %506 = vmatmul.mubr.msk.f32.vlgmr.msra.gmra.mxu0 %vm64_vm0, %v46_v17  ;;  %512 = vmatmul.mubr.msk.f32.vlgmr.msra.gmra.mxu1 %vm64_vm0, %v50_v18 }
  0x1d   :  { %508 = vmatprep.mubr.msk.f32.mxu0 %vm64_vm0, %v47_v19  ;;  %514 = vmatprep.mubr.msk.f32.mxu1 %vm64_vm0, %v51_v20 }
  0x20   :  { %509 = vmatmul.mubr.msk.f32.gmra.mxu0 %vm64_vm0, %v48_v21  ;;  %515 = vmatmul.mubr.msk.f32.gmra.mxu1 %vm64_vm0, %v52_v22 }
  0xdc   :  { %v507_v24 = vpop.f32.mrf.mxu0  ;;  %v513_v25 = vpop.f32.mrf.mxu1 }
  0xdd   :  { %v161_v26 = vadd.f32 %v507_v24, %v460_v23  ;;  %v181_v27 = vadd.f32 %v513_v25, %v460_v23 }
  0xde   :  { %v155_v28 = vpop.f32.mrf.mxu0  ;;  %v175_v29 = vpop.f32.mrf.mxu1 }
  0xdf   :  { %196 = vst.msk [vmem:[#allocation2 + $0x8] sm:$0xff] %vm194_vm1, %v161_v26  ;;  %200 = vst.msk [vmem:[#allocation2 + $0x28] sm:$0xff] %vm194_vm1, %v181_v27  ;;  %v156_v30 = vadd.f32 %v460_v23, %v155_v28  ;;  %v176_v31 = vadd.f32 %v460_v23, %v175_v29 }
  0xe0   :  { %v510_v32 = vpop.f32.mrf.mxu0  ;;  %v516_v33 = vpop.f32.mrf.mxu1 }
  0xe1   :  { %195 = vst.msk [vmem:[#allocation2] sm:$0xff] %vm194_vm1, %v156_v30  ;;  %199 = vst.msk [vmem:[#allocation2 + $0x20] sm:$0xff] %vm194_vm1, %v176_v31  ;;  %v171_v34 = vadd.f32 %v510_v32, %v460_v23  ;;  %v191_v35 = vadd.f32 %v516_v33, %v460_v23 }
  0xe2   :  { %v165_v36 = vpop.f32.mrf.mxu0  ;;  %v185_v37 = vpop.f32.mrf.mxu1 }
  0xe3   :  { %198 = vst.msk [vmem:[#allocation2 + $0x18] sm:$0xff] %vm194_vm1, %v171_v34  ;;  %202 = vst.msk [vmem:[#allocation2 + $0x38] sm:$0xff] %vm194_vm1, %v191_v35  ;;  %v166_v38 = vadd.f32 %v460_v23, %v165_v36  ;;  %v186_v39 = vadd.f32 %v460_v23, %v185_v37 }
  0xe5   :  { %197 = vst.msk [vmem:[#allocation2 + $0x10] sm:$0xff] %vm194_vm1, %v166_v38  ;;  %201 = vst.msk [vmem:[#allocation2 + $0x30] sm:$0xff] %vm194_vm1, %v186_v39 }
  0xe6 LB: > { %v662_v40 = vmov 0.0   ;;  %vm663_vm2 = vmmov 0   ;;  %s664_s4 = smov 64   ;;  %s469_s30 = sshll.u32 %s659_s0, 3  ;;  %s659_s0 = sphi %s834_s0, %s219_s0   ;;  %v655_v10 = vphi %v774_v10, %v881_v10  }
  0xe7   : > { %517 = vmatprep.subr.mxu0 %v662_v40  ;;  %525 = vmatprep.mubr.msk.f32.mxu0 %vm663_vm2, %v662_v40  ;;  %s222_s10 = scalar_lea.vmem [#allocation2], %s469_s30  ;;  %s665_s11 = smov 96  }
  0xe8   : > { %518 = vmatpush3.msra.mxu0 %v742_v3  ;;  %528 = vmatprep.subr.mxu1 %v662_v40  ;;  %s666_s12 = smov 32   ;;  %s413_s13 = scalar_lea.vmem [#allocation6], %s469_s30 }
  0xe9   : > { %519 = vmatprep.subr.mxu0 %v662_v40  ;;  %529 = vmatpush3.msra.mxu1 %v767_v8  ;;  %s219_s0 = sadd.s32 1, %s659_s0  }
  0xea   : > { %520 = vmatpush3.msra.mxu0 %v737_v2  ;;  %530 = vmatprep.subr.mxu1 %v662_v40  ;;  %p216_p5 = scmp.ge.s32.totalorder %s219_s0, 8  }
  0xeb   : > { %521 = vmatprep.subr.mxu0 %v662_v40  ;;  %531 = vmatpush3.msra.mxu1 %v762_v7  ;;  %s667_s6 = smov (%p216_p5), [#allocation6]  }
  0xec   : > { %522 = vmatpush3.msra.mxu0 %v732_v1  ;;  %532 = vmatprep.subr.mxu1 %v662_v40  ;;  %v223_v44 = vld [vmem:[%s222_s10] sm:$0xff]  ;;  %s422_s14 = sshll.u32 (%p216_p5), %s667_s6, 4  ;;  %s423_s14 = int_to_ptr.vmem [resolvable:$true] %s422_s14 }
  0xed   : > { %523 = vmatprep.subr.mxu0 %v662_v40  ;;  %533 = vmatpush3.msra.mxu1 %v757_v6  ;;  %s599_s7 = scalar_lea.vmem (%p216_p5), %s423_s14, 1024  ;;  %p604_p7 = scmp.lt.s32.totalorder (%p216_p5), %s423_s14, %s423_s14 }
  0xee   : > { %524 = vmatpush3.msra.mxu0 %v727_v0  ;;  %534 = vmatprep.subr.mxu1 %v662_v40  ;;  %p600_p6 = scmp.ne.s32.totalorder (%p216_p5), %s423_s14, %s599_s7  ;;  %p605_p8 = scmp.lt.s32.totalorder (%p216_p5), %s599_s7, %s599_s7 }
  0xef   : > { %526 = vmatmul.mubr.msk.f32.vlgmr.msra.gmra.mxu0 %vm64_vm0, %v655_v10  ;;  %535 = vmatpush3.msra.mxu1 %v752_v5 }
  0xf0   : > { %536 = vmatprep.mubr.msk.f32.mxu1 %vm663_vm2, %v662_v40  ;;  %p606_p9 = por (%p216_p5), %p605_p8, %p604_p7 }
  0xf2   :  { %p607_p10 = pnand (%p216_p5), %p606_p9, %p600_p6 }
 0x1af   : > { %v299_v41 = vpop.f32.mrf.mxu0 }
 0x1b0   : > { %v300_v42 = vadd.f32 %v747_v4, %v299_v41 }
 0x1b1   : > { %v527_v43 = vpop.f32.mrf.mxu0 }
 0x1b2   : > { %311 = vrot.lane.b32.xlu0 %v300_v42, %s664_s4  ;;  %v303_v45 = vadd.f32 %v300_v42, %v223_v44 }
 0x1b4   : > { %v472_v46 = vmul.f32 -1.442695, %v303_v45 }
 0x1b6   : > { %573 = vpow2.f32 %v472_v46 }
 0x1c3   : > { %v574_v47 = vpop.eup %573 }
 0x1c4   : > { %v307_v48 = vadd.f32 1.0, %v574_v47 }
 0x1c6   : > { %575 = vrcp.f32 %v307_v48 }
 0x1d3   : > { %v576_v49 = vpop.eup %575 }
 0x1d4   : > { %v321_v56 = vsub.f32 1.0, %v576_v49 }
 0x224   : > { %v312_v50 = vpop.permute.xlu0 %311 }
 0x225   : > { %v314_v51 = vmul.f32 %v576_v49, %v312_v50 }
 0x227   : > { %316 = vrot.lane.b32.xlu0 %v314_v51, %s664_s4 }
 0x299   : > { %v317_v52 = vpop.permute.xlu0 %316 }
 0x29a   : > { %v319_v53 = vadd.f32 %v317_v52, %v223_v44 }
 0x29c   : > { %577 = vtanh.f32 %v319_v53 }
 0x2a9   : > { %v578_v54 = vpop.eup %577 }
 0x2aa   : > { %323 = vrot.lane.b32.xlu1 %v578_v54, %s665_s11 }
 0x2ae   : > { %327 = vrot.lane.b32.xlu1 %v655_v10, %s666_s12 }
 0x31c   : > { %v324_v55 = vpop.permute.xlu1 %323 }
 0x31d   : > { %v326_v58 = vmul.f32 %v324_v55, %v321_v56 }
 0x320   : > { %v328_v57 = vpop.permute.xlu1 %327 }
 0x321   : > { %v330_v59 = vmul.f32 %v576_v49, %v328_v57 }
 0x323   : > { %v331_v60 = vadd.f32 %v330_v59, %v326_v58 }
 0x325   : > { %339 = vrot.lane.b32.xlu0 %v331_v60, %s665_s11 }
 0x397   : > { %v340_v61 = vpop.permute.xlu0 %339  }
 0x398   : > { %537 = vmatmul.mubr.msk.f32.vlgmr.msra.gmra.mxu1 %vm64_vm0, %v340_v61  ;;  %v881_v10 = vmov %v340_v61  ;;  %416 = vst.msk [vmem:[#allocation7] sm:$0xff] (%p216_p5), %vm64_vm0, %v340_v61 }
 0x457   :  { %218 = sbr.rel (!%p216_p5) target bundleno = 230 (0xe6), region = 73 }
 0x458   : > { %v409_v62 = vpop.f32.mrf.mxu1 }
 0x459   : > { %v410_v63 = vadd.f32 %v772_v9, %v409_v62 }
 0x45a   : > { %v538_v11 = vpop.f32.mrf.mxu1 }
 0x45b   : > { %414 = vst [vmem:[%s413_s13] sm:$0xff] %v410_v63 }
 0x45c   :  { %610 = shalt.err (!%p607_p10)
}
 0x45d   :  { %s668_s15 = smov 128   ;;  %s669_s16 = smov 8  }
 0x45e   :  { %428 = dma.vmem_to_hbm [thread:$0]  %s423_s14, 1024, %s879_s8, [#allocation5], %s668_s15, %s668_s15, %s669_s16  }
 0x45f   :  { %s670_s19 = smov [#allocation7]  }
 0x460   :  { %s435_s20 = sshll.u32 %s670_s19, 4  ;;  %s436_s20 = int_to_ptr.vmem [resolvable:$true] %s435_s20 }
 0x461   :  { %s619_s21 = scalar_lea.vmem %s436_s20, 128  ;;  %p624_p12 = scmp.lt.s32.totalorder %s436_s20, %s436_s20 }
 0x462   :  { %p620_p11 = scmp.ne.s32.totalorder %s436_s20, %s619_s21  ;;  %p625_p13 = scmp.lt.s32.totalorder %s619_s21, %s619_s21 }
 0x464   :  { %p626_p0 = por %p625_p13, %p624_p12 }
 0x466   :  { %p627_p1 = pnand %p626_p0, %p620_p11 }
 0x468   :  { %630 = shalt.err (!%p627_p1)
}
 0x469   :  { %438 = dma.vmem_to_hbm [thread:$0]  %s436_s20, 128, %s880_s9, [#allocation8]  }
 0x46a   :  { %649 = dma.done.wait [#allocation5], 1024  }
 0x46b   :  { %650 = vsyncadd [#allocation5], 4294966272 }
 0x46c   :  { %651 = dma.done.wait [#allocation8], 128  }
 0x46d   :  { %652 = vsyncadd [#allocation8], 4294967168 }
 0x46e   :  { %445 = vsyncpa [#allocation4], 1 }
 0x46f   :  { %446 = vsyncpa [#allocation5], 1 }
 0x470   :  { %447 = vsyncpa [#allocation8], 1 }

</bundles_post_ra>
